<compile_context>
chip_gen: v7x
topology: tpu7x:2x2x1
jax: 0.10.0
libtpu: 0.0.40
codegen_flags: <defaults>
</compile_context>

<pallas_src>
import math
from functools import partial

import jax
import jax.numpy as jnp
from jax import lax
from jax.experimental import pallas as pl
from jax.experimental.pallas import tpu as pltpu

_LANES = 128
_MAX_COLS = 1024
_TARGET_BLOCK_BYTES = 1 << 20          # ~1 MiB blocks pipeline well on v5e/v6e/v7x
_TWO_PI = 2.0 * math.pi
_M1 = -2048144789                      # 0x85EBCA6B as int32
_M2 = -1028477387                      # 0xC2B2AE35 as int32


def _srl(h, n):
    """Logical right shift for int32 (arithmetic shift + mask) — works everywhere."""
    return (h >> n) & ((1 << (32 - n)) - 1)


def _fmix32(h):
    """murmur3 finalizer: full-avalanche 32-bit mix (int32, wraparound)."""
    h = h ^ _srl(h, 16)
    h = h * _M1
    h = h ^ _srl(h, 13)
    h = h * _M2
    h = h ^ _srl(h, 16)
    return h


def _fast_sin(phi):
    """sin(phi) for phi in [-pi, pi]; max abs error ~1e-3; VPU-only ops."""
    y = 1.2732395447351628 * phi - 0.4052847345693511 * phi * jnp.abs(phi)
    return 0.225 * (y * jnp.abs(y) - y) + y


def _gaussian_noise_kernel(key_ref, x_ref, o_ref, *, stddev):
    """o = x + stddev * z, z ~ N(0,1), generated fully in-kernel."""
    tr, cols = x_ref.shape
    half = cols // 2

    # Globally unique per-element-pair counter: includes the tile offset so
    # different grid tiles never repeat noise; the pre-scrambled key (from SMEM)
    # translates the counter space per seed.
    tile_off = pl.program_id(0) * (tr * half)
    row = lax.broadcasted_iota(jnp.int32, (tr, half), 0)
    col = lax.broadcasted_iota(jnp.int32, (tr, half), 1)
    ctr = tile_off + row * half + col

    bits = _fmix32(ctr + key_ref[0])
    hi = _srl(bits, 16)                # 16 random bits
    lo = bits & 0xFFFF                 # 16 more random bits

    inv = 1.0 / 65536.0
    u1 = 1.0 - hi.astype(jnp.float32) * inv        # (0, 1]  -> log() is safe
    u2 = lo.astype(jnp.float32) * inv              # [0, 1)

    # Box-Muller; BOTH outputs are used: z1 -> left half of tile, z2 -> right.
    r = jnp.sqrt(-2.0 * jnp.log(u1))
    phi = _TWO_PI * u2 - math.pi                   # [-pi, pi)
    w = phi + 0.5 * math.pi                        # phase shift for the cosine
    w = jnp.where(w > math.pi, w - _TWO_PI, w)
    z1 = r * _fast_sin(w)                          # ~ r * cos(theta)
    z2 = r * _fast_sin(phi)                        # ~ r * sin(theta)

    o_ref[:, :half] = (x_ref[:, :half].astype(jnp.float32)
                       + stddev * z1).astype(o_ref.dtype)
    o_ref[:, half:] = (x_ref[:, half:].astype(jnp.float32)
                       + stddev * z2).astype(o_ref.dtype)


def _choose_cols(total):
    for c in (_MAX_COLS, 512, 256, _LANES):
        if total % c == 0:
            return c
    return None


def gaussian_noise(x, stddev, seed=0, training=True, block_bytes=_TARGET_BLOCK_BYTES):
    """Pallas equivalent of GaussianNoise.forward (any shape, e.g. NCHW)."""
    if not training:
        return x                       # eval mode: identity, like the PyTorch module

    orig_shape = x.shape
    total = x.size
    flat = x.reshape(-1)

    cols = _choose_cols(total)
    if cols is None:
        # Cold path: element count not a multiple of 128 -> pad once.
        # TODO(synk): replace with a masked partial final tile to avoid this copy.
        cols = _LANES
        pad = (-total) % (8 * _LANES)
        flat = jnp.concatenate([flat, jnp.zeros((pad,), x.dtype)])

    rows = flat.size // cols
    x2 = flat.reshape(rows, cols)      # lane-dense slab, no data movement

    # ~1 MiB blocks (row count a multiple of 8 sublanes), or the whole array if smaller.
    tr = max(8, (block_bytes // (cols * x2.dtype.itemsize)) // 8 * 8)
    tr = min(tr, rows)
    grid = (pl.cdiv(rows, tr),)

    # Pre-scrambled seed -> a pseudo-random translation of the counter space.
    key = _fmix32(jnp.asarray(seed, dtype=jnp.int32) ^ 668265295).reshape(1)

    # NOTE: stddev is a module-constructor constant in the PyTorch spec, so it is
    # baked in statically; pass it through SMEM instead if it must vary at runtime.
    # input_output_aliases={1: 0} could additionally be used for in-place reuse.
    out2 = pl.pallas_call(
        partial(_gaussian_noise_kernel, stddev=float(stddev)),
        out_shape=jax.ShapeDtypeStruct((rows, cols), x.dtype),
        grid_spec=pltpu.PrefetchScalarGridSpec(
            num_scalar_prefetch=1,                       # key lands in SMEM
            grid=grid,
            in_specs=[pl.BlockSpec((tr, cols), lambda i, key: (i, 0))],
            out_specs=pl.BlockSpec((tr, cols), lambda i, key: (i, 0)),
        ),
        compiler_params=pltpu.CompilerParams(
            dimension_semantics=("parallel",),           # shard tiles across TCs (v7x)
            vmem_limit_bytes=32 * 1024 * 1024,
        ),
    )(key, x2)

    out_flat = out2.reshape(-1)
    if out_flat.size != total:
        out_flat = out_flat[:total]
    return out_flat.reshape(orig_shape)


if __name__ == "__main__":
    key0 = jax.random.PRNGKey(0)
    # Small NCHW activation consistent with a conv feature map.
    x = jax.random.normal(key0, (2, 4, 16, 16), dtype=jnp.float32)
    stddev = 0.1

    # Training mode: additive in-kernel Gaussian noise (the hot path).
    y_train = jax.block_until_ready(gaussian_noise(x, stddev, seed=1234, training=True))
    # Eval mode: identity, matching the PyTorch module.
    y_eval = jax.block_until_ready(gaussian_noise(x, stddev, training=False))

    assert y_train.shape == x.shape and y_train.dtype == x.dtype
    assert bool(jnp.all(jnp.isfinite(y_train)))
    assert bool(jnp.allclose(y_eval, x))
    resid = y_train - x
    assert abs(float(jnp.mean(resid))) < 0.02
    assert abs(float(jnp.std(resid)) - stddev) < 0.03

    # Multi-tile path (small blocks forced): exercises the pipelined grid and
    # verifies per-tile noise decorrelation.
    x_big = jax.random.normal(jax.random.PRNGKey(1), (4, 8, 32, 32), dtype=jnp.float32)
    y_big = jax.block_until_ready(
        gaussian_noise(x_big, stddev, seed=7, training=True, block_bytes=16 * 1024))
    n_big = (y_big - x_big).reshape(32, 1024)
    assert bool(jnp.all(jnp.isfinite(y_big)))
    assert abs(float(jnp.std(n_big)) - stddev) < 0.02
    assert not bool(jnp.allclose(n_big[:8], n_big[8:16]))   # tiles must differ

    print("KERNEL_OK")
</pallas_src>

<mosaic_0001>
module attributes {stable_mosaic.version = 11 : i64} {
  func.func @_gaussian_noise_kernel(%arg0: i32, %arg1: memref<1xi32, #tpu.memory_space<smem>>, %arg2: memref<2x1024xf32, #tpu.memory_space<vmem>>, %arg3: memref<2x1024xf32, #tpu.memory_space<vmem>>) attributes {dimension_semantics = [#tpu.dimension_semantics<parallel>], iteration_bounds = array<i64: 1>, scalar_prefetch = 1 : i64, scratch_operands = 0 : i64, tpu.core_type = #tpu.core_type<tc>, window_params = [{transform_indices = @transform_0, window_bounds = array<i64: 2, 1024>}, {transform_indices = @transform_1, window_bounds = array<i64: 2, 1024>}]} {
    %c1024_i32 = arith.constant 1024 : i32
    %0 = arith.muli %arg0, %c1024_i32 : i32
    %1 = tpu.iota {dimensions = array<i32: 0>} : vector<2x512xi32>
    %2 = tpu.iota {dimensions = array<i32: 1>} : vector<2x512xi32>
    %c512_i32 = arith.constant 512 : i32
    %3 = vector.broadcast %c512_i32 : i32 to vector<2x512xi32>
    %4 = arith.muli %1, %3 : vector<2x512xi32>
    %5 = vector.broadcast %0 : i32 to vector<2x512xi32>
    %6 = arith.addi %5, %4 : vector<2x512xi32>
    %7 = arith.addi %6, %2 : vector<2x512xi32>
    %c0 = arith.constant 0 : index
    %8 = memref.load %arg1[%c0] : memref<1xi32, #tpu.memory_space<smem>>
    %9 = vector.broadcast %8 : i32 to vector<2x512xi32>
    %10 = arith.addi %7, %9 : vector<2x512xi32>
    %c16_i32 = arith.constant 16 : i32
    %11 = vector.broadcast %c16_i32 : i32 to vector<2x512xi32>
    %12 = arith.shrsi %10, %11 : vector<2x512xi32>
    %c65535_i32 = arith.constant 65535 : i32
    %13 = vector.broadcast %c65535_i32 : i32 to vector<2x512xi32>
    %14 = arith.andi %12, %13 : vector<2x512xi32>
    %15 = arith.xori %10, %14 : vector<2x512xi32>
    %c-2048144789_i32 = arith.constant -2048144789 : i32
    %16 = vector.broadcast %c-2048144789_i32 : i32 to vector<2x512xi32>
    %17 = arith.muli %15, %16 : vector<2x512xi32>
    %c13_i32 = arith.constant 13 : i32
    %18 = vector.broadcast %c13_i32 : i32 to vector<2x512xi32>
    %19 = arith.shrsi %17, %18 : vector<2x512xi32>
    %c524287_i32 = arith.constant 524287 : i32
    %20 = vector.broadcast %c524287_i32 : i32 to vector<2x512xi32>
    %21 = arith.andi %19, %20 : vector<2x512xi32>
    %22 = arith.xori %17, %21 : vector<2x512xi32>
    %c-1028477387_i32 = arith.constant -1028477387 : i32
    %23 = vector.broadcast %c-1028477387_i32 : i32 to vector<2x512xi32>
    %24 = arith.muli %22, %23 : vector<2x512xi32>
    %c16_i32_0 = arith.constant 16 : i32
    %25 = vector.broadcast %c16_i32_0 : i32 to vector<2x512xi32>
    %26 = arith.shrsi %24, %25 : vector<2x512xi32>
    %c65535_i32_1 = arith.constant 65535 : i32
    %27 = vector.broadcast %c65535_i32_1 : i32 to vector<2x512xi32>
    %28 = arith.andi %26, %27 : vector<2x512xi32>
    %29 = arith.xori %24, %28 : vector<2x512xi32>
    %c16_i32_2 = arith.constant 16 : i32
    %30 = vector.broadcast %c16_i32_2 : i32 to vector<2x512xi32>
    %31 = arith.shrsi %29, %30 : vector<2x512xi32>
    %c65535_i32_3 = arith.constant 65535 : i32
    %32 = vector.broadcast %c65535_i32_3 : i32 to vector<2x512xi32>
    %33 = arith.andi %31, %32 : vector<2x512xi32>
    %c65535_i32_4 = arith.constant 65535 : i32
    %34 = vector.broadcast %c65535_i32_4 : i32 to vector<2x512xi32>
    %35 = arith.andi %29, %34 : vector<2x512xi32>
    %36 = arith.sitofp %33 : vector<2x512xi32> to vector<2x512xf32>
    %cst = arith.constant 1.52587891E-5 : f32
    %37 = vector.broadcast %cst : f32 to vector<2x512xf32>
    %38 = arith.mulf %36, %37 : vector<2x512xf32>
    %cst_5 = arith.constant 1.000000e+00 : f32
    %39 = vector.broadcast %cst_5 : f32 to vector<2x512xf32>
    %40 = arith.subf %39, %38 : vector<2x512xf32>
    %41 = arith.sitofp %35 : vector<2x512xi32> to vector<2x512xf32>
    %cst_6 = arith.constant 1.52587891E-5 : f32
    %42 = vector.broadcast %cst_6 : f32 to vector<2x512xf32>
    %43 = arith.mulf %41, %42 : vector<2x512xf32>
    %44 = math.log %40 : vector<2x512xf32>
    %cst_7 = arith.constant -2.000000e+00 : f32
    %45 = vector.broadcast %cst_7 : f32 to vector<2x512xf32>
    %46 = arith.mulf %45, %44 : vector<2x512xf32>
    %47 = math.sqrt %46 : vector<2x512xf32>
    %cst_8 = arith.constant 6.28318548 : f32
    %48 = vector.broadcast %cst_8 : f32 to vector<2x512xf32>
    %49 = arith.mulf %48, %43 : vector<2x512xf32>
    %cst_9 = arith.constant 3.14159274 : f32
    %50 = vector.broadcast %cst_9 : f32 to vector<2x512xf32>
    %51 = arith.subf %49, %50 : vector<2x512xf32>
    %cst_10 = arith.constant 1.57079637 : f32
    %52 = vector.broadcast %cst_10 : f32 to vector<2x512xf32>
    %53 = arith.addf %51, %52 : vector<2x512xf32>
    %cst_11 = arith.constant 3.14159274 : f32
    %54 = vector.broadcast %cst_11 : f32 to vector<2x512xf32>
    %55 = arith.cmpf ogt, %53, %54 : vector<2x512xf32>
    %cst_12 = arith.constant 6.28318548 : f32
    %56 = vector.broadcast %cst_12 : f32 to vector<2x512xf32>
    %57 = arith.subf %53, %56 : vector<2x512xf32>
    %58 = arith.select %55, %57, %53 : vector<2x512xi1>, vector<2x512xf32>
    %cst_13 = arith.constant 1.27323949 : f32
    %59 = vector.broadcast %cst_13 : f32 to vector<2x512xf32>
    %60 = arith.mulf %59, %58 : vector<2x512xf32>
    %cst_14 = arith.constant 0.405284733 : f32
    %61 = vector.broadcast %cst_14 : f32 to vector<2x512xf32>
    %62 = arith.mulf %61, %58 : vector<2x512xf32>
    %63 = math.absf %58 : vector<2x512xf32>
    %64 = arith.mulf %62, %63 : vector<2x512xf32>
    %65 = arith.subf %60, %64 : vector<2x512xf32>
    %66 = math.absf %65 : vector<2x512xf32>
    %67 = arith.mulf %65, %66 : vector<2x512xf32>
    %68 = arith.subf %67, %65 : vector<2x512xf32>
    %cst_15 = arith.constant 2.250000e-01 : f32
    %69 = vector.broadcast %cst_15 : f32 to vector<2x512xf32>
    %70 = arith.mulf %69, %68 : vector<2x512xf32>
    %71 = arith.addf %70, %65 : vector<2x512xf32>
    %72 = arith.mulf %47, %71 : vector<2x512xf32>
    %cst_16 = arith.constant 1.27323949 : f32
    %73 = vector.broadcast %cst_16 : f32 to vector<2x512xf32>
    %74 = arith.mulf %73, %51 : vector<2x512xf32>
    %cst_17 = arith.constant 0.405284733 : f32
    %75 = vector.broadcast %cst_17 : f32 to vector<2x512xf32>
    %76 = arith.mulf %75, %51 : vector<2x512xf32>
    %77 = math.absf %51 : vector<2x512xf32>
    %78 = arith.mulf %76, %77 : vector<2x512xf32>
    %79 = arith.subf %74, %78 : vector<2x512xf32>
    %80 = math.absf %79 : vector<2x512xf32>
    %81 = arith.mulf %79, %80 : vector<2x512xf32>
    %82 = arith.subf %81, %79 : vector<2x512xf32>
    %cst_18 = arith.constant 2.250000e-01 : f32
    %83 = vector.broadcast %cst_18 : f32 to vector<2x512xf32>
    %84 = arith.mulf %83, %82 : vector<2x512xf32>
    %85 = arith.addf %84, %79 : vector<2x512xf32>
    %86 = arith.mulf %47, %85 : vector<2x512xf32>
    %c0_19 = arith.constant 0 : index
    %c0_20 = arith.constant 0 : index
    %87 = vector.load %arg2[%c0_19, %c0_20] : memref<2x1024xf32, #tpu.memory_space<vmem>>, vector<2x512xf32>
    %cst_21 = arith.constant 1.000000e-01 : f32
    %88 = vector.broadcast %cst_21 : f32 to vector<2x512xf32>
    %89 = arith.mulf %88, %72 : vector<2x512xf32>
    %90 = arith.addf %87, %89 : vector<2x512xf32>
    %c0_22 = arith.constant 0 : index
    %c0_23 = arith.constant 0 : index
    %91 = vector.load %arg3[%c0_22, %c0_23] : memref<2x1024xf32, #tpu.memory_space<vmem>>, vector<2x512xf32>
    tpu.vector_store %arg3[%c0_22, %c0_23], %90 {strides = array<i32>} : memref<2x1024xf32, #tpu.memory_space<vmem>>, vector<2x512xf32>,
    %c0_24 = arith.constant 0 : index
    %c512 = arith.constant 512 : index
    %92 = vector.load %arg2[%c0_24, %c512] : memref<2x1024xf32, #tpu.memory_space<vmem>>, vector<2x512xf32>
    %cst_25 = arith.constant 1.000000e-01 : f32
    %93 = vector.broadcast %cst_25 : f32 to vector<2x512xf32>
    %94 = arith.mulf %93, %86 : vector<2x512xf32>
    %95 = arith.addf %92, %94 : vector<2x512xf32>
    %c0_26 = arith.constant 0 : index
    %c512_27 = arith.constant 512 : index
    %96 = vector.load %arg3[%c0_26, %c512_27] : memref<2x1024xf32, #tpu.memory_space<vmem>>, vector<2x512xf32>
    tpu.vector_store %arg3[%c0_26, %c512_27], %95 {strides = array<i32>} : memref<2x1024xf32, #tpu.memory_space<vmem>>, vector<2x512xf32>,
    return
  }
  func.func @transform_0(%arg0: i32, %arg1: memref<1xi32, #tpu.memory_space<smem>>) -> (i32, i32) {
    %c0_i32 = arith.constant 0 : i32
    %c0_i32_0 = arith.constant 0 : i32
    return %arg0, %c0_i32 : i32, i32
  }
  func.func @transform_1(%arg0: i32, %arg1: memref<1xi32, #tpu.memory_space<smem>>) -> (i32, i32) {
    %c0_i32 = arith.constant 0 : i32
    %c0_i32_0 = arith.constant 0 : i32
    return %arg0, %c0_i32 : i32, i32
  }
}

</mosaic_0001>

<bundles_post_ra>
// kernel: tpu_custom_call.1
= control target key start
LH: loop header
LB: loop body
LE: loop exit
PB: predicated region body
PF: predicated region fallthrough
CT: control target
= control target key end

     0   :  { %8 = vsyncpa [#allocation5], 0  ;;  %s578_s0 = inlined_call_operand.<no memory space> [shape: s32[1], index: 0, kind: input, shape index: {}]   ;;  %s579_s1 = inlined_call_operand.hbm [shape: f32[2,1024], index: 1, kind: input, shape index: {}]   ;;  %s580_s2 = inlined_call_operand.hbm [shape: f32[2,1024], index: 2, kind: output, shape index: {}]  }
   0x1   :  { %9 = vsyncpa [#allocation6], 0  ;;  %s436_s9 = smov [#allocation4]   ;;  %s388_s13 = scalar_lea.hbm %s579_s1, 256 }
   0x2   :  { %s16_s10 = sshll.u32 %s436_s9, 4  ;;  %p389_p0 = scmp.ne.s32.totalorder %s579_s1, %s388_s13  ;;  %s17_s10 = int_to_ptr.vmem [resolvable:$true] %s16_s10 }
   0x3   :  { %p392_p1 = scmp.lt.u32.totalorder %s388_s13, %s579_s1 }
   0x5   :  { %p394_p2 = pnand %p392_p1, %p389_p0 }
   0x7   :  { %397 = shalt.err (!%p394_p2)
}
   0x8   :  { %s398_s18 = scalar_lea.vmem %s17_s10, 256  ;;  %p403_p4 = scmp.lt.s32.totalorder %s17_s10, %s17_s10 }
   0x9   :  { %p399_p3 = scmp.ne.s32.totalorder %s17_s10, %s398_s18  ;;  %p404_p5 = scmp.lt.s32.totalorder %s398_s18, %s398_s18 }
   0xb   :  { %p405_p6 = por %p404_p5, %p403_p4 }
   0xd   :  { %p406_p7 = pnand %p405_p6, %p399_p3 }
   0xf   :  { %409 = shalt.err (!%p406_p7)
}
  0x10   :  { %19 = dma.hbm_to_vmem [thread:$0]  %s579_s1, 256, %s17_s10, [#allocation5]  }
  0x11   :  { %432 = dma.done.wait [#allocation5], 256  }
  0x12   :  { %433 = vsyncadd [#allocation5], 4294967040  ;;  %v24_v0 = vlaneseq  ;;  %v39_v7 = vstv %s578_s0  ;;  %s438_s0 = smov [#allocation7]  }
  0x13   :  { %s336_s1 = sshll.u32 %s438_s0, 4  ;;  %s337_s1 = int_to_ptr.vmem [resolvable:$true] %s336_s1 }
  0x14   :  { %v466_v1 = vshrl.u32 %v24_v0, 7  ;;  %v27_v2 = vand.u32 127, %v24_v0  ;;  %s410_s23 = scalar_lea.vmem %s337_s1, 256  ;;  %p415_p9 = scmp.lt.s32.totalorder %s337_s1, %s337_s1 }
  0x15   :  { %p411_p8 = scmp.ne.s32.totalorder %s337_s1, %s410_s23  ;;  %p416_p10 = scmp.lt.s32.totalorder %s410_s23, %s410_s23 }
  0x16   :  { %v28_v3 = vadd.s32 128, %v27_v2  ;;  %v29_v4 = vadd.s32 256, %v27_v2  ;;  %v30_v5 = vadd.s32 384, %v27_v2  ;;  %v31_v6 = vmul.u32 512, %v466_v1 }
  0x17   :  { %p417_p11 = por %p416_p10, %p415_p9 }
  0x18   :  { %v34_v8 = vadd.s32 %v31_v6, %v27_v2  ;;  %v35_v9 = vadd.s32 %v31_v6, %v28_v3  ;;  %v36_v10 = vadd.s32 %v31_v6, %v29_v4  ;;  %v37_v11 = vadd.s32 %v31_v6, %v30_v5 }
  0x19   :  { %p418_p12 = pnand %p417_p11, %p411_p8 }
  0x1a   :  { %v40_v12 = vadd.s32 %v39_v7, %v34_v8  ;;  %v41_v13 = vadd.s32 %v39_v7, %v35_v9  ;;  %v42_v14 = vadd.s32 %v39_v7, %v36_v10  ;;  %v43_v15 = vadd.s32 %v39_v7, %v37_v11 }
  0x1c   :  { %v345_v16 = vshrl.u32 %v40_v12, 16  ;;  %v346_v17 = vshrl.u32 %v41_v13, 16  ;;  %v347_v18 = vshrl.u32 %v42_v14, 16  ;;  %v348_v19 = vshrl.u32 %v43_v15, 16 }
  0x1e   :  { %v52_v20 = vxor.u32 %v345_v16, %v40_v12  ;;  %v53_v21 = vxor.u32 %v346_v17, %v41_v13  ;;  %v54_v22 = vxor.u32 %v347_v18, %v42_v14  ;;  %v55_v23 = vxor.u32 %v348_v19, %v43_v15 }
  0x20   :  { %v56_v24 = vmul.u32 2246822507, %v52_v20  ;;  %v57_v25 = vmul.u32 2246822507, %v53_v21 }
  0x21   :  { %v58_v26 = vmul.u32 2246822507, %v54_v22  ;;  %v59_v27 = vmul.u32 2246822507, %v55_v23 }
  0x22   :  { %v349_v28 = vshrl.u32 %v56_v24, 13  ;;  %v350_v29 = vshrl.u32 %v57_v25, 13 }
  0x23   :  { %v351_v30 = vshrl.u32 %v58_v26, 13  ;;  %v352_v31 = vshrl.u32 %v59_v27, 13 }
  0x24   :  { %v68_v32 = vxor.u32 %v349_v28, %v56_v24  ;;  %v69_v33 = vxor.u32 %v350_v29, %v57_v25 }
  0x25   :  { %v70_v34 = vxor.u32 %v351_v30, %v58_v26  ;;  %v71_v35 = vxor.u32 %v352_v31, %v59_v27  ;;  %v437_v30 = vmov 1983009808  }
  0x26   :  { %v72_v36 = vmul.u32 3266489909, %v68_v32  ;;  %v73_v37 = vmul.u32 3266489909, %v69_v33  ;;  %v284_v31 = vunpack.c.l.s4 %v437_v30 }
  0x27   :  { %v74_v38 = vmul.u32 3266489909, %v70_v34  ;;  %v75_v39 = vmul.u32 3266489909, %v71_v35 }
  0x28   :  { %v353_v40 = vshrl.u32 %v72_v36, 16  ;;  %v354_v41 = vshrl.u32 %v73_v37, 16 }
  0x29   :  { %v355_v42 = vshrl.u32 %v74_v38, 16  ;;  %v356_v43 = vshrl.u32 %v75_v39, 16 }
  0x2a   :  { %v84_v44 = vxor.u32 %v353_v40, %v72_v36  ;;  %v85_v45 = vxor.u32 %v354_v41, %v73_v37 }
  0x2b   :  { %v86_v46 = vxor.u32 %v355_v42, %v74_v38  ;;  %v87_v47 = vxor.u32 %v356_v43, %v75_v39 }
  0x2c   :  { %v357_v48 = vshrl.u32 %v84_v44, 16  ;;  %v358_v49 = vshrl.u32 %v85_v45, 16  ;;  %v96_v50 = vand.u32 65535, %v84_v44  ;;  %v97_v51 = vand.u32 65535, %v85_v45 }
  0x2d   :  { %v359_v52 = vshrl.u32 %v86_v46, 16  ;;  %v360_v53 = vshrl.u32 %v87_v47, 16  ;;  %v98_v54 = vand.u32 65535, %v86_v46  ;;  %v99_v55 = vand.u32 65535, %v87_v47 }
  0x2e   :  { %v100_v56 = vcvt.s32.f32 %v357_v48  ;;  %v101_v57 = vcvt.s32.f32 %v358_v49  ;;  %v112_v58 = vcvt.s32.f32 %v96_v50  ;;  %v113_v59 = vcvt.s32.f32 %v97_v51 }
  0x2f   :  { %v102_v60 = vcvt.s32.f32 %v359_v52  ;;  %v103_v61 = vcvt.s32.f32 %v360_v53  ;;  %v114_v62 = vcvt.s32.f32 %v98_v54  ;;  %v115_v63 = vcvt.s32.f32 %v99_v55 }
  0x30   :  { %v104_v0 = vmul.f32 1.5258789e-05, %v100_v56  ;;  %v105_v2 = vmul.f32 1.5258789e-05, %v101_v57  ;;  %v116_v3 = vmul.f32 1.5258789e-05, %v112_v58  ;;  %v117_v4 = vmul.f32 1.5258789e-05, %v113_v59 }
  0x31   :  { %v106_v5 = vmul.f32 1.5258789e-05, %v102_v60  ;;  %v107_v6 = vmul.f32 1.5258789e-05, %v103_v61  ;;  %v118_v7 = vmul.f32 1.5258789e-05, %v114_v62  ;;  %v119_v8 = vmul.f32 1.5258789e-05, %v115_v63 }
  0x32   :  { %v108_v9 = vsub.f32 1.0, %v104_v0  ;;  %v109_v10 = vsub.f32 1.0, %v105_v2  ;;  %v160_v11 = vmul.f32 6.2831855, %v116_v3  ;;  %v161_v12 = vmul.f32 6.2831855, %v117_v4 }
  0x33   :  { %v110_v13 = vsub.f32 1.0, %v106_v5  ;;  %v111_v14 = vsub.f32 1.0, %v107_v6  ;;  %v162_v15 = vmul.f32 6.2831855, %v118_v7  ;;  %v163_v16 = vmul.f32 6.2831855, %v119_v8 }
  0x34   :  { %372 = vlog2.f32 %v108_v9  ;;  %v472_v17 = vadd.f32 -3.1415927, %v160_v11  ;;  %v474_v18 = vadd.f32 -3.1415927, %v161_v12  ;;  %v285_v48 = vunpack.c.0.s8 %v284_v31 }
  0x35   :  { %374 = vlog2.f32 %v109_v10  ;;  %v476_v19 = vadd.f32 -3.1415927, %v162_v15  ;;  %v478_v20 = vadd.f32 -3.1415927, %v163_v16 }
  0x36   :  { %376 = vlog2.f32 %v110_v13  ;;  %v168_v21 = vadd.f32 1.5707964, %v472_v17  ;;  %v169_v22 = vadd.f32 1.5707964, %v474_v18  ;;  %v485_v35 = vmul.f32 1.2732395, %v472_v17 }
  0x37   :  { %378 = vlog2.f32 %v111_v14  ;;  %v170_v23 = vadd.f32 1.5707964, %v476_v19  ;;  %v171_v24 = vadd.f32 1.5707964, %v478_v20  ;;  %v488_v43 = vmul.f32 1.2732395, %v474_v18 }
  0x38   :  { %vm172_vm0 = vcmp.gt.f32.partialorder %v168_v21, 3.1415927  ;;  %vm173_vm1 = vcmp.gt.f32.partialorder %v169_v22, 3.1415927  ;;  %v365_v25 = vadd.f32 -6.2831855, %v168_v21  ;;  %v500_v2 = vsub.s32 %v285_v48, %v466_v1 }
  0x39   :  { %vm174_vm2 = vcmp.gt.f32.partialorder %v170_v23, 3.1415927  ;;  %vm175_vm3 = vcmp.gt.f32.partialorder %v171_v24, 3.1415927  ;;  %v366_v26 = vadd.f32 -6.2831855, %v169_v22 }
  0x3a   :  { %v367_v27 = vadd.f32 -6.2831855, %v170_v23  ;;  %v368_v28 = vadd.f32 -6.2831855, %v171_v24  ;;  %v180_v29 = vsel %vm172_vm0, %v365_v25, %v168_v21  ;;  %v495_v61 = vmul.f32 1.2732395, %v476_v19 }
  0x3b   :  { %v181_v32 = vsel %vm173_vm1, %v366_v26, %v169_v22  ;;  %v188_v33 = vmul.f32 0.40528473, %v180_v29  ;;  %v192_v34 = vand.u32 2147483647, %v180_v29  ;;  %v184_v38 = vmul.f32 1.2732395, %v180_v29 }
  0x3c   :  { %v182_v36 = vsel %vm174_vm2, %v367_v27, %v170_v23  ;;  %v183_v37 = vsel %vm175_vm3, %v368_v28, %v171_v24  ;;  %v189_v39 = vmul.f32 0.40528473, %v181_v32  ;;  %v185_v40 = vmul.f32 1.2732395, %v181_v32 }
  0x3d   :  { %v190_v41 = vmul.f32 0.40528473, %v182_v36  ;;  %v196_v42 = vmul.f32 %v192_v34, %v188_v33  ;;  %v186_v45 = vmul.f32 1.2732395, %v182_v36  ;;  %v193_v46 = vand.u32 2147483647, %v181_v32 }
  0x3e   :  { %v373_v44 = vpop.eup %372  ;;  %v194_v47 = vand.u32 2147483647, %v182_v36  ;;  %v191_v51 = vmul.f32 0.40528473, %v183_v37  ;;  %v195_v52 = vand.u32 2147483647, %v183_v37 }
  0x3f   :  { %v375_v49 = vpop.eup %374  ;;  %v121_v50 = vmul.f32 0.6931472, %v373_v44  ;;  %v197_v55 = vmul.f32 %v193_v46, %v189_v39  ;;  %v490_v57 = vsub.f32 %v184_v38, %v196_v42  ;;  %v187_v0 = vmul.f32 1.2732395, %v183_v37 }
  0x40   :  { %v377_v53 = vpop.eup %376  ;;  %v123_v54 = vmul.f32 0.6931472, %v375_v49  ;;  %v198_v56 = vmul.f32 %v194_v47, %v190_v41  ;;  %v199_v4 = vmul.f32 %v195_v52, %v191_v51  ;;  %v231_v1 = vmul.f32 1.2732395, %v478_v20 }
  0x41   :  { %v379_v58 = vpop.eup %378  ;;  %v125_v59 = vmul.f32 0.6931472, %v377_v53  ;;  %v492_v60 = vmul.f32 -2.0, %v121_v50  ;;  %v201_v5 = vsub.f32 %v185_v40, %v197_v55  ;;  %v204_v8 = vand.u32 2147483647, %v490_v57 }
  0x42   :  { %v127_v62 = vmul.f32 0.6931472, %v379_v58  ;;  %v497_v63 = vmul.f32 -2.0, %v123_v54  ;;  %v202_v7 = vsub.f32 %v186_v45, %v198_v56  ;;  %v232_v9 = vmul.f32 0.40528473, %v472_v17 }
  0x43   :  { %v502_v3 = vmul.f32 -2.0, %v125_v59  ;;  %380 = vrsqrt.f32 %v492_v60  ;;  %vm134_vm4 = vcmp.eq.f32.partialorder %v492_v60, inf  ;;  %vm136_vm5 = vcmp.eq.f32.partialorder %v492_v60, 0.0 }
  0x44   :  { %v505_v6 = vmul.f32 -2.0, %v127_v62  ;;  %382 = vrsqrt.f32 %v497_v63  ;;  %v137_v10 = vand.u32 2147483648, %v492_v60  ;;  %vm141_vm6 = vcmp.eq.f32.partialorder %v497_v63, inf }
  0x45   :  { %384 = vrsqrt.f32 %v502_v3  ;;  %v144_v11 = vand.u32 2147483648, %v497_v63  ;;  %vm143_vm7 = vcmp.eq.f32.partialorder %v497_v63, 0.0  ;;  %vm148_vm8 = vcmp.eq.f32.partialorder %v502_v3, inf }
  0x46   :  { %386 = vrsqrt.f32 %v505_v6  ;;  %v151_v12 = vand.u32 2147483648, %v502_v3  ;;  %v158_v13 = vand.u32 2147483648, %v505_v6  ;;  %v203_v14 = vsub.f32 %v187_v0, %v199_v4 }
  0x47   :  { %v205_v15 = vand.u32 2147483647, %v201_v5  ;;  %vm150_vm9 = vcmp.eq.f32.partialorder %v502_v3, 0.0  ;;  %vm155_vm10 = vcmp.eq.f32.partialorder %v505_v6, inf  ;;  %v206_v16 = vand.u32 2147483647, %v202_v7 }
  0x48   :  { %v208_v21 = vmul.f32 %v204_v8, %v490_v57  ;;  %v233_v22 = vmul.f32 0.40528473, %v474_v18  ;;  %v234_v23 = vmul.f32 0.40528473, %v476_v19  ;;  %vm157_vm11 = vcmp.eq.f32.partialorder %v505_v6, 0.0 }
  0x49   :  { %v207_v24 = vand.u32 2147483647, %v203_v14  ;;  %v209_v25 = vmul.f32 %v205_v15, %v201_v5  ;;  %v235_v26 = vmul.f32 0.40528473, %v478_v20  ;;  %v236_v27 = vand.u32 2147483647, %v472_v17 }
  0x4a   :  { %v210_v28 = vmul.f32 %v206_v16, %v202_v7  ;;  %v212_v29 = vsub.f32 %v208_v21, %v490_v57  ;;  %v237_v30 = vand.u32 2147483647, %v474_v18  ;;  %v238_v31 = vand.u32 2147483647, %v476_v19 }
  0x4b   :  { %v211_v32 = vmul.f32 %v207_v24, %v203_v14  ;;  %v213_v33 = vsub.f32 %v209_v25, %v201_v5  ;;  %v239_v34 = vand.u32 2147483647, %v478_v20  ;;  %v240_v36 = vmul.f32 %v236_v27, %v232_v9 }
  0x4c   :  { %v214_v37 = vsub.f32 %v210_v28, %v202_v7  ;;  %v216_v38 = vmul.f32 0.225, %v212_v29  ;;  %v241_v39 = vmul.f32 %v237_v30, %v233_v22  ;;  %v242_v40 = vmul.f32 %v238_v31, %v234_v23 }
  0x4d   :  { %v381_v41 = vpop.eup %380  ;;  %v215_v42 = vsub.f32 %v211_v32, %v203_v14  ;;  %v217_v44 = vmul.f32 0.225, %v213_v33  ;;  %v243_v17 = vmul.f32 %v239_v34, %v235_v26  ;;  %v244_v45 = vsub.f32 %v485_v35, %v240_v36 }
  0x4e   :  { %v383_v46 = vpop.eup %382  ;;  %v133_v18 = vmul.f32 %v381_v41, %v492_v60  ;;  %v218_v47 = vmul.f32 0.225, %v214_v37  ;;  %v220_v19 = vadd.f32 %v216_v38, %v490_v57  ;;  %v245_v48 = vsub.f32 %v488_v43, %v241_v39  ;;  %v272_v39 = vld [vmem:[#allocation4] sm:$0xff] }
  0x4f   :  { %v385_v20 = vpop.eup %384  ;;  %v140_v49 = vmul.f32 %v383_v46, %v497_v63  ;;  %v219_v50 = vmul.f32 0.225, %v215_v42  ;;  %v221_v51 = vadd.f32 %v217_v44, %v201_v5  ;;  %v246_v52 = vsub.f32 %v495_v61, %v242_v40 }
  0x50   :  { %v387_v53 = vpop.eup %386  ;;  %v135_v35 = vsel %vm134_vm4, %v492_v60, %v133_v18  ;;  %v147_v54 = vmul.f32 %v385_v20, %v502_v3  ;;  %v222_v55 = vadd.f32 %v218_v47, %v202_v7  ;;  %v247_v56 = vsub.f32 %v231_v1, %v243_v17 }
  0x51   :  { %v138_v57 = vsel %vm136_vm5, %v137_v10, %v135_v35  ;;  %v142_v43 = vsel %vm141_vm6, %v497_v63, %v140_v49  ;;  %v154_v58 = vmul.f32 %v387_v53, %v505_v6  ;;  %v223_v59 = vadd.f32 %v219_v50, %v203_v14 }
  0x52   :  { %v145_v61 = vsel %vm143_vm7, %v144_v11, %v142_v43  ;;  %v149_v62 = vsel %vm148_vm8, %v502_v3, %v147_v54  ;;  %v224_v0 = vmul.f32 %v220_v19, %v138_v57  ;;  %v248_v4 = vand.u32 2147483647, %v244_v45 }
  0x53   :  { %v152_v60 = vsel %vm150_vm9, %v151_v12, %v149_v62  ;;  %v156_v5 = vsel %vm155_vm10, %v505_v6, %v154_v58  ;;  %v225_v7 = vmul.f32 %v221_v51, %v145_v61  ;;  %v249_v8 = vand.u32 2147483647, %v245_v48  ;;  %v301_v51 = vld [vmem:[#allocation4 + $0x8] sm:$0xff] }
  0x54   :  { %v159_v1 = vsel %vm157_vm11, %v158_v13, %v156_v5  ;;  %v226_v63 = vmul.f32 %v222_v55, %v152_v60  ;;  %v250_v9 = vand.u32 2147483647, %v246_v52  ;;  %v251_v10 = vand.u32 2147483647, %v247_v56 }
  0x55   :  { %v227_v11 = vmul.f32 %v223_v59, %v159_v1  ;;  %v252_v14 = vmul.f32 %v248_v4, %v244_v45  ;;  %v253_v15 = vmul.f32 %v249_v8, %v245_v48  ;;  %v273_v16 = vmul.f32 0.1, %v224_v0 }
  0x56   :  { %v254_v21 = vmul.f32 %v250_v9, %v246_v52  ;;  %v255_v22 = vmul.f32 %v251_v10, %v247_v56  ;;  %v274_v3 = vmul.f32 0.1, %v225_v7  ;;  %v275_v12 = vmul.f32 0.1, %v226_v63 }
  0x57   :  { %v256_v23 = vsub.f32 %v252_v14, %v244_v45  ;;  %v257_v24 = vsub.f32 %v253_v15, %v245_v48  ;;  %v276_v25 = vmul.f32 0.1, %v227_v11 }
  0x58   :  { %v258_v26 = vsub.f32 %v254_v21, %v246_v52  ;;  %v259_v27 = vsub.f32 %v255_v22, %v247_v56  ;;  %v281_v28 = vcombine.low %v273_v16, %v274_v3 }
  0x59   :  { %v260_v29 = vmul.f32 0.225, %v256_v23  ;;  %v261_v6 = vmul.f32 0.225, %v257_v24  ;;  %v282_v13 = vcombine.low %v275_v12, %v276_v25 }
  0x5a   :  { %v262_v30 = vmul.f32 0.225, %v258_v26  ;;  %v263_v31 = vmul.f32 0.225, %v259_v27  ;;  %v289_v32 = vrot.slane %v281_v28, %v500_v2 }
  0x5b   :  { %v264_v33 = vadd.f32 %v260_v29, %v244_v45  ;;  %v265_v34 = vadd.f32 %v261_v6, %v245_v48  ;;  %v296_v36 = vrot.slane %v282_v13, %v500_v2 }
  0x5c   :  { %v266_v37 = vadd.f32 %v262_v30, %v246_v52  ;;  %v267_v38 = vadd.f32 %v263_v31, %v247_v56 }
  0x5d   :  { %v268_v40 = vmul.f32 %v264_v33, %v138_v57  ;;  %v269_v41 = vmul.f32 %v265_v34, %v145_v61  ;;  %v297_v42 = vcombine.low %v289_v32, %v296_v36 }
  0x5e   :  { %v270_v44 = vmul.f32 %v266_v37, %v152_v60  ;;  %v271_v17 = vmul.f32 %v267_v38, %v159_v1 }
  0x5f   :  { %v299_v46 = vadd.f32 %v297_v42, %v272_v39  ;;  %v302_v18 = vmul.f32 0.1, %v268_v40  ;;  %v303_v47 = vmul.f32 0.1, %v269_v41 }
  0x60   :  { %v304_v19 = vmul.f32 0.1, %v270_v44  ;;  %v305_v20 = vmul.f32 0.1, %v271_v17 }
  0x61   :  { %300 = vst [vmem:[#allocation7] sm:$0xff] %v299_v46  ;;  %v310_v49 = vcombine.low %v302_v18, %v303_v47 }
  0x62   :  { %v311_v50 = vcombine.low %v304_v19, %v305_v20 }
  0x63   :  { %v318_v45 = vrot.slane %v310_v49, %v500_v2 }
  0x64   :  { %v325_v48 = vrot.slane %v311_v50, %v500_v2 }
  0x66   :  { %v326_v52 = vcombine.low %v318_v45, %v325_v48 }
  0x68   :  { %v328_v53 = vadd.f32 %v326_v52, %v301_v51 }
  0x6a   :  { %329 = vst [vmem:[#allocation7 + $0x8] sm:$0xff] %v328_v53 }
  0x6b   :  { %421 = shalt.err (!%p418_p12)
}
  0x6c   :  { %s422_s26 = scalar_lea.hbm %s580_s2, 256 }
  0x6d   :  { %p423_p13 = scmp.ne.s32.totalorder %s580_s2, %s422_s26  ;;  %p426_p0 = scmp.lt.u32.totalorder %s422_s26, %s580_s2 }
  0x6f   :  { %p428_p1 = pnand %p426_p0, %p423_p13 }
  0x71   :  { %431 = shalt.err (!%p428_p1)
}
  0x72   :  { %339 = dma.vmem_to_hbm [thread:$0]  %s337_s1, 256, %s580_s2, [#allocation6]  }
  0x73   :  { %434 = dma.done.wait [#allocation6], 256  }
  0x74   :  { %435 = vsyncadd [#allocation6], 4294967040 }
  0x75   :  { %343 = vsyncpa [#allocation5], 1 }
  0x76   :  { %344 = vsyncpa [#allocation6], 1 }

</bundles_post_ra>
